<compile_context>
chip_gen: v7x
topology: tpu7x:2x2x1
jax: 0.10.0
libtpu: 0.0.40
codegen_flags: <defaults>
</compile_context>

<pallas_src>
import math
import functools

import jax
import jax.numpy as jnp
from jax import lax
from jax.experimental import pallas as pl
from jax.experimental.pallas import tpu as pltpu


def _round_up(v, mult):
    return ((v + mult - 1) // mult) * mult


def _arc_margin_kernel(x_ref, wt_ref, inv_wn_ref, label_ref, out_ref,
                       *, s, cos_m, sin_m, th, mm, easy_margin, tn, matmul_dtype):
    x = x_ref[...]                      # (tm, D)  f32
    wt = wt_ref[...]                    # (D, tn)  matmul_dtype
    inv_wn = inv_wn_ref[...]            # (1, tn)  f32  (precomputed 1/||W_c||)
    lbl = label_ref[...]                # (tm, 1)  int32

    # 1/max(||x||, 1e-12) == rsqrt(max(||x||^2, 1e-24)); rsqrt -> EUP slot.
    inv_xn = lax.rsqrt(jnp.maximum(jnp.sum(x * x, axis=1, keepdims=True), 1e-24))

    # Raw matmul on the MXU (bf16 operands, f32 accumulate), then fold the norms.
    dot = jnp.dot(x.astype(matmul_dtype), wt, preferred_element_type=jnp.float32)
    cosine = dot * inv_xn * inv_wn      # (tm, tn) f32

    sine = jnp.sqrt(jnp.clip(1.0 - cosine * cosine, 0.0, 1.0))
    phi = cosine * cos_m - sine * sin_m
    if easy_margin:
        phi = jnp.where(cosine > 0.0, phi, cosine)
    else:
        phi = jnp.where(cosine > th, phi, cosine - mm)

    # One-hot select via iota compare, offset by this C-tile's first class id.
    col0 = pl.program_id(1) * tn
    cls_ids = col0 + lax.broadcasted_iota(jnp.int32, cosine.shape, 1)
    out = jnp.where(cls_ids == lbl, phi, cosine)

    out_ref[...] = (out * s).astype(out_ref.dtype)


def arc_margin_product(x, weight, label, *, s=30.0, m=0.5, easy_margin=False,
                       matmul_dtype=jnp.bfloat16, tm=None, tn=None):
    """x: (B, D) f32; weight: (C, D) f32; label: (B,) int. Returns (B, C) f32."""
    x = x.astype(jnp.float32)
    weight = weight.astype(jnp.float32)
    B, D = x.shape
    C, D2 = weight.shape
    assert D == D2

    cos_m = math.cos(m)
    sin_m = math.sin(m)
    th = math.cos(math.pi - m)
    mm = math.sin(math.pi - m) * m

    # Tile sizes: sublane-aligned B tile, lane-dense C tile (multiple of 128).
    if tm is None:
        tm = min(128, _round_up(B, 8))
    if tn is None:
        tn = min(512, _round_up(C, 128))
    Bp = _round_up(B, tm)
    Cp = _round_up(C, tn)

    # Precompute (once, f32): inverse column norms of W, and W^T in matmul dtype.
    inv_wn = lax.rsqrt(jnp.maximum(jnp.sum(weight * weight, axis=1), 1e-24))
    wt = weight.T.astype(matmul_dtype)                       # (D, C)

    label = label.astype(jnp.int32)
    if Bp != B:
        x = jnp.pad(x, ((0, Bp - B), (0, 0)))
        label = jnp.pad(label, (0, Bp - B))
    if Cp != C:
        wt = jnp.pad(wt, ((0, 0), (0, Cp - C)))
        inv_wn = jnp.pad(inv_wn, (0, Cp - C))
    inv_wn = inv_wn.reshape(1, Cp).astype(jnp.float32)
    label_col = label.reshape(Bp, 1)

    kernel = functools.partial(
        _arc_margin_kernel,
        s=s, cos_m=cos_m, sin_m=sin_m, th=th, mm=mm,
        easy_margin=easy_margin, tn=tn, matmul_dtype=matmul_dtype,
    )

    grid = (Bp // tm, Cp // tn)
    w_itemsize = jnp.dtype(matmul_dtype).itemsize
    cost = pl.CostEstimate(
        flops=2 * Bp * Cp * D,
        transcendentals=Bp * Cp + Bp,               # sqrt(sine) + rsqrt(norm)
        bytes_accessed=(Bp * D * 4 + D * Cp * w_itemsize
                        + Cp * 4 + Bp * 4 + Bp * Cp * 4),
    )

    out = pl.pallas_call(
        kernel,
        out_shape=jax.ShapeDtypeStruct((Bp, Cp), jnp.float32),
        grid=grid,
        in_specs=[
            pl.BlockSpec((tm, D), lambda i, j: (i, 0)),      # x rows
            pl.BlockSpec((D, tn), lambda i, j: (0, j)),      # W^T column tile
            pl.BlockSpec((1, tn), lambda i, j: (0, j)),      # inv col norms
            pl.BlockSpec((tm, 1), lambda i, j: (i, 0)),      # labels
        ],
        out_specs=pl.BlockSpec((tm, tn), lambda i, j: (i, j)),
        compiler_params=pltpu.CompilerParams(
            dimension_semantics=("parallel", "parallel")),
        cost_estimate=cost,
    )(x, wt, inv_wn, label_col)

    return out[:B, :C]


def _reference(x, weight, label, *, s=30.0, m=0.5, easy_margin=False,
               matmul_dtype=jnp.float32):
    """Pure-JAX reference. matmul_dtype=float32 is module-faithful (normalize
    then linear); bf16 matches the kernel's bf16-operand / f32-accumulate path."""
    cos_m, sin_m = math.cos(m), math.sin(m)
    th = math.cos(math.pi - m)
    mm = math.sin(math.pi - m) * m
    inv_xn = 1.0 / jnp.maximum(jnp.linalg.norm(x, axis=1, keepdims=True), 1e-12)
    inv_wn = 1.0 / jnp.maximum(jnp.linalg.norm(weight, axis=1, keepdims=True), 1e-12)
    if matmul_dtype == jnp.float32:
        cosine = (x * inv_xn) @ (weight * inv_wn).T
    else:
        dot = jnp.dot(x.astype(matmul_dtype), weight.T.astype(matmul_dtype),
                      preferred_element_type=jnp.float32)
        cosine = dot * inv_xn * inv_wn.reshape(1, -1)
    sine = jnp.sqrt(jnp.clip(1.0 - cosine ** 2, 0.0, 1.0))
    phi = cosine * cos_m - sine * sin_m
    if easy_margin:
        phi = jnp.where(cosine > 0.0, phi, cosine)
    else:
        phi = jnp.where(cosine > th, phi, cosine - mm)
    one_hot = jax.nn.one_hot(label, weight.shape[0], dtype=jnp.float32)
    return (one_hot * phi + (1.0 - one_hot) * cosine) * s


if __name__ == "__main__":
    # Small, module-consistent shapes; chosen so that both grid axes have >1
    # tile and both axes need padding (exercises iota offset + pad/slice paths).
    B = 10
    in_features = 32
    out_features = 300

    key = jax.random.PRNGKey(0)
    kx, kw, kl = jax.random.split(key, 3)

    x = jax.random.normal(kx, (B, in_features), dtype=jnp.float32)

    # Xavier-uniform init for weight (out_features, in_features), deterministic.
    bound = math.sqrt(6.0 / (in_features + out_features))
    weight = jax.random.uniform(
        kw, (out_features, in_features), dtype=jnp.float32,
        minval=-bound, maxval=bound)

    label = jax.random.randint(kl, (B,), 0, out_features, dtype=jnp.int32)

    # --- f32 matmul path: tight check vs the module-faithful reference -------
    out_f32 = arc_margin_product(x, weight, label, s=30.0, m=0.5,
                                 easy_margin=False,
                                 matmul_dtype=jnp.float32, tm=8, tn=128)
    out_f32 = jax.block_until_ready(out_f32)
    ref_f32 = _reference(x, weight, label, s=30.0, m=0.5, easy_margin=False,
                         matmul_dtype=jnp.float32)
    assert out_f32.shape == (B, out_features)
    assert jnp.allclose(out_f32, ref_f32, atol=2e-4, rtol=2e-4), \
        "f32 kernel mismatch vs reference"

    # --- bf16 weight-streaming path (production default): check vs a
    #     numerics-matched bf16-operand / f32-accumulate reference ------------
    out_bf16 = arc_margin_product(x, weight, label, s=30.0, m=0.5,
                                  easy_margin=False,
                                  matmul_dtype=jnp.bfloat16, tm=8, tn=128)
    out_bf16 = jax.block_until_ready(out_bf16)
    ref_bf16 = _reference(x, weight, label, s=30.0, m=0.5, easy_margin=False,
                          matmul_dtype=jnp.bfloat16)
    assert out_bf16.shape == (B, out_features)
    assert jnp.allclose(out_bf16, ref_bf16, atol=1e-2, rtol=1e-2), \
        "bf16 kernel mismatch vs bf16 reference"

    print("KERNEL_OK")
</pallas_src>

<mosaic_0001>
module attributes {stable_mosaic.version = 11 : i64} {
  func.func @_arc_margin_kernel(%arg0: i32, %arg1: i32, %arg2: memref<8x32xf32, #tpu.memory_space<vmem>>, %arg3: memref<32x128xf32, #tpu.memory_space<vmem>>, %arg4: memref<1x128xf32, #tpu.memory_space<vmem>>, %arg5: memref<8x1xi32, #tpu.memory_space<vmem>>, %arg6: memref<8x128xf32, #tpu.memory_space<vmem>>) attributes {dimension_semantics = [#tpu.dimension_semantics<parallel>, #tpu.dimension_semantics<parallel>], iteration_bounds = array<i64: 2, 3>, scalar_prefetch = 0 : i64, scratch_operands = 0 : i64, tpu.core_type = #tpu.core_type<tc>, window_params = [{transform_indices = @transform_0, window_bounds = array<i64: 8, 32>}, {transform_indices = @transform_1, window_bounds = array<i64: 32, 128>}, {transform_indices = @transform_2, window_bounds = array<i64: 1, 128>}, {transform_indices = @transform_3, window_bounds = array<i64: 8, 1>}, {transform_indices = @transform_4, window_bounds = array<i64: 8, 128>}]} {
    %c0 = arith.constant 0 : index
    %c0_0 = arith.constant 0 : index
    %0 = vector.load %arg2[%c0, %c0_0] : memref<8x32xf32, #tpu.memory_space<vmem>>, vector<8x32xf32>
    %c0_1 = arith.constant 0 : index
    %c0_2 = arith.constant 0 : index
    %1 = vector.load %arg3[%c0_1, %c0_2] : memref<32x128xf32, #tpu.memory_space<vmem>>, vector<32x128xf32>
    %c0_3 = arith.constant 0 : index
    %c0_4 = arith.constant 0 : index
    %2 = vector.load %arg4[%c0_3, %c0_4] : memref<1x128xf32, #tpu.memory_space<vmem>>, vector<1x128xf32>
    %c0_5 = arith.constant 0 : index
    %c0_6 = arith.constant 0 : index
    %3 = vector.load %arg5[%c0_5, %c0_6] : memref<8x1xi32, #tpu.memory_space<vmem>>, vector<8x1xi32>
    %4 = arith.mulf %0, %0 : vector<8x32xf32>
    %cst = arith.constant dense<0.000000e+00> : vector<8xf32>
    %5 = vector.multi_reduction <add>, %4, %cst [1] : vector<8x32xf32> to vector<8xf32>
    %6 = vector.shape_cast %5 : vector<8xf32> to vector<8x1xf32>
    %cst_7 = arith.constant 1.000000e-24 : f32
    %7 = vector.broadcast %cst_7 : f32 to vector<8x1xf32>
    %8 = arith.maximumf %6, %7 : vector<8x1xf32>
    %9 = math.rsqrt %8 : vector<8x1xf32>
    %cst_8 = arith.constant dense<0.000000e+00> : vector<8x128xf32>
    %10 = tpu.matmul %0, %1, %cst_8 {dimension_numbers = #tpu.dot_dimension_numbers<[1], [0], [0], [1], [0, 0, 1, 1], [], []>} : vector<8x32xf32>, vector<32x128xf32>, vector<8x128xf32> -> vector<8x128xf32>
    %11 = vector.broadcast %9 : vector<8x1xf32> to vector<8x128xf32>
    %12 = arith.mulf %10, %11 : vector<8x128xf32>
    %13 = vector.broadcast %2 : vector<1x128xf32> to vector<8x128xf32>
    %14 = arith.mulf %12, %13 : vector<8x128xf32>
    %15 = arith.mulf %14, %14 : vector<8x128xf32>
    %cst_9 = arith.constant 1.000000e+00 : f32
    %16 = vector.broadcast %cst_9 : f32 to vector<8x128xf32>
    %17 = arith.subf %16, %15 : vector<8x128xf32>
    %cst_10 = arith.constant 0.000000e+00 : f32
    %cst_11 = arith.constant 1.000000e+00 : f32
    %18 = vector.broadcast %cst_10 : f32 to vector<8x128xf32>
    %19 = arith.maximumf %18, %17 : vector<8x128xf32>
    %20 = vector.broadcast %cst_11 : f32 to vector<8x128xf32>
    %21 = arith.minimumf %20, %19 : vector<8x128xf32>
    %22 = math.sqrt %21 : vector<8x128xf32>
    %cst_12 = arith.constant 0.87758255 : f32
    %23 = vector.broadcast %cst_12 : f32 to vector<8x128xf32>
    %24 = arith.mulf %14, %23 : vector<8x128xf32>
    %cst_13 = arith.constant 0.47942555 : f32
    %25 = vector.broadcast %cst_13 : f32 to vector<8x128xf32>
    %26 = arith.mulf %22, %25 : vector<8x128xf32>
    %27 = arith.subf %24, %26 : vector<8x128xf32>
    %cst_14 = arith.constant -0.87758255 : f32
    %28 = vector.broadcast %cst_14 : f32 to vector<8x128xf32>
    %29 = arith.cmpf ogt, %14, %28 : vector<8x128xf32>
    %cst_15 = arith.constant 0.239712775 : f32
    %30 = vector.broadcast %cst_15 : f32 to vector<8x128xf32>
    %31 = arith.subf %14, %30 : vector<8x128xf32>
    %32 = arith.select %29, %27, %31 : vector<8x128xi1>, vector<8x128xf32>
    %c128_i32 = arith.constant 128 : i32
    %33 = arith.muli %arg1, %c128_i32 : i32
    %34 = tpu.iota {dimensions = array<i32: 1>} : vector<8x128xi32>
    %35 = vector.broadcast %33 : i32 to vector<8x128xi32>
    %36 = arith.addi %35, %34 : vector<8x128xi32>
    %37 = vector.broadcast %3 : vector<8x1xi32> to vector<8x128xi32>
    %38 = arith.cmpi eq, %36, %37 : vector<8x128xi32>
    %39 = arith.select %38, %32, %14 : vector<8x128xi1>, vector<8x128xf32>
    %cst_16 = arith.constant 3.000000e+01 : f32
    %40 = vector.broadcast %cst_16 : f32 to vector<8x128xf32>
    %41 = arith.mulf %39, %40 : vector<8x128xf32>
    %c0_17 = arith.constant 0 : index
    %c0_18 = arith.constant 0 : index
    %42 = vector.load %arg6[%c0_17, %c0_18] : memref<8x128xf32, #tpu.memory_space<vmem>>, vector<8x128xf32>
    tpu.vector_store %arg6[%c0_17, %c0_18], %41 {strides = array<i32>} : memref<8x128xf32, #tpu.memory_space<vmem>>, vector<8x128xf32>,
    return
  }
  func.func @transform_0(%arg0: i32, %arg1: i32) -> (i32, i32) {
    %c0_i32 = arith.constant 0 : i32
    %c0_i32_0 = arith.constant 0 : i32
    return %arg0, %c0_i32 : i32, i32
  }
  func.func @transform_1(%arg0: i32, %arg1: i32) -> (i32, i32) {
    %c0_i32 = arith.constant 0 : i32
    %c0_i32_0 = arith.constant 0 : i32
    return %c0_i32, %arg1 : i32, i32
  }
  func.func @transform_2(%arg0: i32, %arg1: i32) -> (i32, i32) {
    %c0_i32 = arith.constant 0 : i32
    %c0_i32_0 = arith.constant 0 : i32
    return %c0_i32, %arg1 : i32, i32
  }
  func.func @transform_3(%arg0: i32, %arg1: i32) -> (i32, i32) {
    %c0_i32 = arith.constant 0 : i32
    %c0_i32_0 = arith.constant 0 : i32
    return %arg0, %c0_i32 : i32, i32
  }
  func.func @transform_4(%arg0: i32, %arg1: i32) -> (i32, i32) {
    %c0_i32 = arith.constant 0 : i32
    return %arg0, %arg1 : i32, i32
  }
}

</mosaic_0001>

<bundles_post_ra>
// kernel: tpu_custom_call.1
= control target key start
LH: loop header
LB: loop body
LE: loop exit
PB: predicated region body
PF: predicated region fallthrough
CT: control target
= control target key end

     0   :  { %9 = vsyncpa [#allocation3], 0  ;;  %s1108_s0 = inlined_call_operand.vmem [shape: f32[16,32], index: 0, kind: input, shape index: {}]   ;;  %s1109_s1 = inlined_call_operand.hbm [shape: f32[32,384], index: 1, kind: input, shape index: {}]   ;;  %s1110_s2 = inlined_call_operand.vmem [shape: f32[1,384], index: 2, kind: input, shape index: {}]   ;;  %s1111_s3 = inlined_call_operand.vmem [shape: s32[16,1], index: 3, kind: input, shape index: {}]   ;;  %s1112_s4 = inlined_call_operand.hbm [shape: f32[16,384], index: 4, kind: output, shape index: {}]  }
   0x1   :  { %11 = vsyncpa [#allocation3 + $0x1], 0 }
   0x2   :  { %12 = vsyncpa [#allocation4], 0 }
   0x3   :  { %14 = vsyncpa [#allocation4 + $0x1], 0  ;;  %s877_s15 = smov 0   ;;  %s879_s16 = smov 0  }
   0x4   :  { %s881_s17 = smov 0   ;;  %s883_s18 = smov 0  }
   0x5   :  { %s885_s19 = smov 0   ;;  %s887_s20 = smov 0  }
   0x6   :  { %s889_s21 = smov 0   ;;  %s891_s22 = smov 0  }
   0x7   :  { %s893_s23 = smov 0   ;;  %s895_s24 = smov 0  }
   0x8   :  { %s897_s25 = smov 0  }
   0x9 LB: > { %s533_s26 = sadd.s32 4294967295, %s841_s25   ;;  %s534_s27 = sadd.s32 4294967294, %s841_s25   ;;  %s841_s25 = sphi %s897_s25, %s20_s25   ;;  %s837_s24 = sphi %s895_s24, %s1136_s24   ;;  %s833_s23 = sphi %s893_s23, %s1135_s23   ;;  %s829_s22 = sphi %s891_s22, %s1134_s22   ;;  %s825_s21 = sphi %s889_s21, %s1133_s21   ;;  %s821_s20 = sphi %s887_s20, %s1132_s20   ;;  %s817_s19 = sphi %s885_s19, %s1131_s19   ;;  %s813_s18 = sphi %s883_s18, %s1130_s18   ;;  %s809_s17 = sphi %s881_s17, %s1129_s17   ;;  %s805_s16 = sphi %s879_s16, %s1128_s16   ;;  %s801_s15 = sphi %s877_s15, %s1127_s15  }
   0xa   : > { %s29_s28 = sadd.s32 1, %s833_s23  ;;  %s32_s29 = sadd.s32 1, %s837_s24 }
   0xb   : > { %p30_p0 = scmp.ge.s32.totalorder %s29_s28, 3  ;;  %s65_s30 = sadd.s32 1, %s821_s20 }
   0xc   : > { %p72_p1 = scmp.ne.s32.totalorder %s821_s20, %s817_s19  ;;  %p73_p2 = scmp.eq.s32.totalorder %s841_s25, 0 }
   0xd   : > { %s1138_s28 = smov (%p30_p0, %s29_s28), 0  ;;  %s1140_s29 = smov (!%p30_p0, %s32_s29), %s837_s24 }
   0xe   : > { %1116 = sst [smem:[#allocation8_spill]] %s1138_s28  ;;  %s62_s5 = ssub.s32 %s833_s23, %s1138_s28 }
   0xf   : > { %p943_p3 = por %p73_p2, %p72_p1  ;;  %p34_p4 = scmp.ge.s32.totalorder %s1140_s29, 2 }
  0x10   : > { %p63_p5 = scmp.eq.s32.totalorder %s62_s5, 0  ;;  %p78_p6 = scmp.ne.s32.totalorder %s817_s19, %s813_s18 }
  0x11   : > { %p79_p7 = scmp.eq.s32.totalorder %s533_s26, 0  ;;  %s1142_s29 = smov (%p34_p4, %s1140_s29), 0 }
  0x12   : > { %1118 = sst [smem:[#allocation9_spill]] %s1142_s29  ;;  %s140_s9 = ssub.s32 %s837_s24, %s1142_s29 }
  0x13   : > { %s951_s7 = scalar_select %p63_p5, %s821_s20, %s65_s30  }
  0x14   : > { %p953_p8 = por %p79_p7, %p78_p6  ;;  %s142_s10 = sor.u32 %s140_s9, %s62_s5 }
  0x15   : > { %s145_s11 = sadd.s32 1, %s809_s17  ;;  %p143_p9 = scmp.eq.s32.totalorder %s142_s10, 0 }
  0x16   : > { %p155_p10 = scmp.ne.s32.totalorder %s809_s17, %s805_s16  ;;  %p156_p11 = scmp.eq.s32.totalorder %s533_s26, 5 }
  0x17   : > { %p161_p12 = scmp.ne.s32.totalorder %s805_s16, %s801_s15  ;;  %p162_p0 = scmp.eq.s32.totalorder %s534_s27, 5 }
  0x18   : > { %s965_s12 = scalar_select %p143_p9, %s809_s17, %s145_s11  }
  0x19   : > { %p967_p13 = por %p156_p11, %p155_p10  ;;  %p587_p1 = scmp.lt.s32.totalorder %s841_s25, 6 }
  0x1a   : > { %p972_p2 = por %p162_p0, %p161_p12  ;;  %s189_s18 = sand.u32 1, %s821_s20  }
  0x1b   : > { %s1120_s13 = scalar_select %p967_p13, 1, 0 }
  0x1c   : > { %s1121_s14 = scalar_select %p972_p2, 1, 0 }
  0x1d   : > { %s537_s30 = sshll.u32 %s189_s18, 5  ;;  %s538_s5 = sshll.u32 %s833_s23, 7 }
  0x1e   : > { %s981_s26 = scalar_lea.hbm %s1109_s1, %s538_s5  ;;  %s193_s11 = scalar_lea.vmem [#allocation2], %s537_s30 }
  0x1f   : > { %s199_s29 = sshll.u32 %s193_s11, 4  ;;  %p987_p4 = pnand %p587_p1, %p943_p3  ;;  %s983_s29 = int_to_ptr.vmem [resolvable:$true] %s199_s29 }
  0x20   : > { %s991_s28 = scalar_lea.sflag [#allocation3], %s189_s18  ;;  %s689_s9 = scalar_lea.hbm %s981_s26, 512 }
  0x21   : > { %p690_p5 = scmp.ne.s32.totalorder %s981_s26, %s689_s9  ;;  %p691_p6 = pneg %p987_p4 }
  0x22   : > { %s694_s6 = scalar_lea.hbm %s1109_s1, 1536  ;;  %p695_p3 = scmp.lt.u32.totalorder %s981_s26, %s1109_s1 }
  0x23   : > { %p692_p7 = pnand %p691_p6, %p690_p5  ;;  %p696_p10 = scmp.lt.u32.totalorder %s694_s6, %s689_s9 }
  0x24   : > { %p698_p12 = scmp.lt.u32.totalorder %s689_s9, %s981_s26 }
  0x25   : > { %p693_p9 = pneg %p692_p7  ;;  %p697_p11 = por %p696_p10, %p695_p3 }
  0x27   : > { %p699_p0 = por %p698_p12, %p697_p11 }
  0x29   : > { %p700_p1 = pnand %p699_p0, %p693_p9 }
  0x2b   : > { %703 = shalt.err (!%p700_p1)
}
  0x2c   : > { %s704_s18 = scalar_lea.vmem %s983_s29, 512  ;;  %s843_s30 = smov [#allocation2]  }
  0x2d   : > { %p705_p5 = scmp.ne.s32.totalorder %s983_s29, %s704_s18  ;;  %s709_s5 = sshll.u32 %s843_s30, 4  ;;  %s710_s5 = int_to_ptr.vmem [resolvable:$false] %s709_s5 }
  0x2e   : > { %s711_s10 = scalar_lea.vmem %s710_s5, 1024  ;;  %p712_p13 = scmp.lt.s32.totalorder %s983_s29, %s710_s5 }
  0x2f   : > { %p707_p7 = pnand %p705_p5, %p691_p6  ;;  %p713_p3 = scmp.lt.s32.totalorder %s711_s10, %s704_s18 }
  0x31   : > { %p708_p2 = pneg %p707_p7  ;;  %p714_p10 = por %p713_p3, %p712_p13 }
  0x33   : > { %p715_p11 = pnand %p714_p10, %p708_p2 }
  0x35   : > { %718 = shalt.err (!%p715_p11)
}
  0x36   : > { %s844_s9 = smov 384   ;;  %s845_s6 = smov 128  }
  0x37   : > { %s846_s11 = smov 8   ;;  %p539_p6 = scmp.ge.s32.totalorder %s841_s25, 1 }
  0x38   : > { %582 = dma.hbm_to_vmem [thread:$0]  (!%p987_p4), %s981_s26, 512, %s983_s29, %s991_s28, %s844_s9, %s845_s6, %s846_s11  }
  0x39   : > { %p220_p9 = scmp.lt.s32.totalorder %s841_s25, 7 }
  0x3b   : > { %p221_p12 = pnand %p539_p6, %p220_p9 }
  0x3c   : > { %s226_s18 = sand.u32 (!%p221_p12), 1, %s817_s19  }
  0x3d   : > { %224 = sbr.rel (%p221_p12) target bundleno = 341 (0x155), region = 36  ;;  %s540_s30 = sshll.u32 (!%p221_p12), %s226_s18, 5 }
  0x3e   : > { %s227_s5 = scalar_lea.sflag (!%p221_p12), [#allocation3], %s226_s18  ;;  %s230_s10 = scalar_lea.vmem (!%p221_p12), [#allocation2], %s540_s30 }
  0x44   : > { %792 = dma.done.wait (%p953_p8), %s227_s5, 512  }
  0x45   : > { %794 = vsyncadd (%p953_p8), %s227_s5, 4294966784  ;;  %p266_p13 = scmp.lt.s32.totalorder %s829_s22, 1  ;;  %v847_v0 = vmov 0.0|0.0   ;;  %vm848_vm0 = vmmov 0   ;;  %v849_v1 = vmov 0.0   ;;  %v850_v2 = vmov 0  }
  0x46   : > { %568 = vmatprep.subr.bf16.mxu0 %v847_v0  ;;  %565 = vmatprep.mubr.msk.f32.mxu0 %vm848_vm0, %v849_v1  ;;  %v278_v3 = vld [vmem:[%s230_s10] sm:$0xff]  ;;  %v279_v4 = vld [vmem:[%s230_s10 + $0x8] sm:$0xff]  ;;  %v280_v5 = vld [vmem:[%s230_s10 + $0x10] sm:$0xff]  ;;  %vm285_vm1 = vcmask 261120   ;;  %p270_p8 = scmp.lt.s32.totalorder %s825_s21, 2  ;;  %v390_v25 = vlaneseq  ;;  %s574_s26 = smul.u32 3, %s829_s22 }
  0x47   : > { %s267_s28 = scalar_select %p266_p13, %s829_s22, 1  ;;  %684 = vset.pattern.permute.xlu0 %v850_v2  ;;  %v569_v6 = vpack.c.bf16 %v279_v4, %v278_v3  ;;  %v281_v7 = vld [vmem:[%s230_s10 + $0x18] sm:$0xff] }
  0x48   : > { %v572_v10 = vpack.c.bf16 %v281_v7, %v280_v5  ;;  %s271_s18 = scalar_select %p270_p8, %s825_s21, 2  ;;  %v391_v26 = vand.u32 127, %v390_v25 }
  0x49   : > { %s542_s29 = sshll.u32 %s267_s28, 3  ;;  %570 = vmatpush3.bf16.msra.mxu0 %v569_v6  ;;  %s547_s28 = sshll.u32 %s825_s21, 7 }
  0x4a   : > { %s269_s9 = scalar_lea.vmem %s1108_s0, %s542_s29  ;;  %571 = vmatprep.subr.bf16.mxu0 %v847_v0  ;;  %s276_s11 = scalar_lea.vmem %s1111_s3, %s542_s29  ;;  %v392_v28 = vstv %s547_s28 }
  0x4b   : > { %v277_v8 = vld [vmem:[%s269_s9] sm:$0xff]  ;;  %s272_s10 = scalar_lea.vmem %s1110_s2, %s271_s18  ;;  %s263_s29 = sand.u32 1, %s805_s16   ;;  %v393_v32 = vadd.s32 %v392_v28, %v391_v26 }
  0x4c   : > { %v284_v9 = vmul.f32 %v277_v8, %v277_v8  ;;  %v283_v12 = vld [vmem:[%s276_s11] sm:$0xff]  ;;  %s541_s27 = sshll.u32 %s263_s29, 3  ;;  %s413_s9 = sadd.s32 %s825_s21, %s574_s26 }
  0x4d   : > { %573 = vmatpush3.bf16.msra.mxu0 %v572_v10  ;;  %v545_v16 = vld [vmem:[%s272_s10] ss:$0 sm:$0xff]  ;;  %s549_s8 = sshll.u32 %s413_s9, 7  ;;  %s265_s6 = scalar_lea.vmem [#allocation5], %s541_s27 }
  0x4e   : > { %v286_v11 = vsel %vm285_vm1, %v284_v9, 0.0  ;;  %s417_s11 = sshll.u32 %s265_s6, 4  ;;  %s1046_s30 = scalar_lea.hbm %s1112_s4, %s549_s8  ;;  %s1048_s11 = int_to_ptr.vmem [resolvable:$true] %s417_s11 }
  0x4f   : > { %287 = vadd.xlane.f32.xlu0 %v286_v11  ;;  %s402_s21 = scalar_lea.sflag [#allocation4], %s263_s29  ;;  %s719_s5 = scalar_lea.vmem %s1048_s11, 128 }
  0x50   : > { %566 = vmatmul.mubr.msk.f32.vlgmr.msra.gmra.mrb[0].mxu0 %vm285_vm1, %v277_v8  ;;  %p720_p2 = scmp.ne.s32.totalorder %s1048_s11, %s719_s5  ;;  %p1123_p4 = scmp.ne.s32.totalorder %s1120_s13, 0 }
  0x51   : > { %s851_s10 = smov [#allocation5]  }
  0x52   : > { %p721_p0 = pnand %p720_p2, %p1123_p4  ;;  %s723_s28 = sshll.u32 %s851_s10, 4  ;;  %s724_s28 = int_to_ptr.vmem [resolvable:$false] %s723_s28 }
  0x53   : > { %s725_s26 = scalar_lea.vmem %s724_s28, 256  ;;  %p726_p5 = scmp.lt.s32.totalorder %s1048_s11, %s724_s28 }
  0x54   : > { %p722_p1 = pneg %p721_p0  ;;  %p727_p7 = scmp.lt.s32.totalorder %s725_s26, %s719_s5 }
  0x56   : > { %p728_p3 = por %p727_p7, %p726_p5 }
  0x58   : > { %p729_p10 = pnand %p728_p3, %p722_p1 }
  0x65   : > { %395 = vperm.xlu0 %684, %v283_v12  }
  0xdc   : > { %v288_v13 = vpop.xlane.xlu0 %287 }
  0xdd   : > { %v289_v14 = vmax.f32 %v288_v13, 1e-24 }
  0xdf   : > { %685 = vrsqrt.f32 %v289_v14 }
  0xe4   : > { %v396_v34 = vpop.permute.xlu0 %395 }
  0xe5   : > { %vm397_vm4 = vcmp.eq.s32.totalorder %v393_v32, %v396_v34 }
  0xe9   : > { %v686_v15 = vpop.eup %685 }
 0x123   : > { %v360_v17 = vpop.f32.mrb[0].mxu0 }
 0x124   : > { %v364_v18 = vmul.f32 %v686_v15, %v360_v17  ;;  %v567_v19 = vpop.f32.mrb[1].mxu0 }
 0x126   : > { %v371_v20 = vmul.f32 %v545_v16, %v364_v18 }
 0x128   : > { %v372_v21 = vmul.f32 %v371_v20, %v371_v20  ;;  %v383_v35 = vmul.f32 0.87758255, %v371_v20  ;;  %v546_v38 = vadd.f32 -0.23971277, %v371_v20  ;;  %vm386_vm5 = vcmp.gt.f32.partialorder %v371_v20, -0.87758255 }
 0x12a   : > { %v373_v22 = vsub.f32 1.0, %v372_v21 }
 0x12c   : > { %v374_v23 = vmax.f32 %v373_v22, 0.0 }
 0x12e   : > { %v375_v24 = vmin.f32 %v374_v23, 1.0 }
 0x130   : > { %687 = vrsqrt.f32 %v375_v24  ;;  %vm378_vm2 = vcmp.eq.f32.partialorder %v375_v24, inf  ;;  %v381_v30 = vand.u32 2147483648, %v375_v24  ;;  %vm380_vm3 = vcmp.eq.f32.partialorder %v375_v24, 0.0 }
 0x13a   : > { %v688_v27 = vpop.eup %687 }
 0x13b   : > { %v377_v29 = vmul.f32 %v688_v27, %v375_v24 }
 0x13d   : > { %v379_v31 = vsel %vm378_vm2, %v375_v24, %v377_v29 }
 0x13e   : > { %v382_v33 = vsel %vm380_vm3, %v381_v30, %v379_v31 }
 0x13f   : > { %v384_v36 = vmul.f32 0.47942555, %v382_v33 }
 0x141   : > { %v385_v37 = vsub.f32 %v383_v35, %v384_v36 }
 0x143   : > { %v388_v39 = vsel %vm386_vm5, %v385_v37, %v546_v38 }
 0x144   : > { %v398_v40 = vsel %vm397_vm4, %v388_v39, %v371_v20 }
 0x145   : > { %v399_v41 = vmul.f32 30.0, %v398_v40 }
 0x147   : > { %400 = vst [vmem:[%s265_s6] sm:$0xff] %v399_v41 }
 0x148   : > { %732 = shalt.err (!%p729_p10)
}
 0x149   : > { %s733_s29 = scalar_lea.hbm %s1046_s30, 128  ;;  %s737_s8 = scalar_lea.hbm %s1112_s4, 768 }
 0x14a   : > { %p734_p11 = scmp.ne.s32.totalorder %s1046_s30, %s733_s29  ;;  %p738_p12 = scmp.lt.u32.totalorder %s1046_s30, %s1112_s4 }
 0x14b   : > { %p739_p13 = scmp.lt.u32.totalorder %s737_s8, %s733_s29  ;;  %p741_p2 = scmp.lt.u32.totalorder %s733_s29, %s1046_s30 }
 0x14c   : > { %p735_p6 = pnand %p734_p11, %p1123_p4 }
 0x14d   : > { %p740_p8 = por %p739_p13, %p738_p12 }
 0x14e   : > { %p736_p9 = pneg %p735_p6 }
 0x14f   : > { %p742_p0 = por %p741_p2, %p740_p8 }
 0x151   : > { %p743_p1 = pnand %p742_p0, %p736_p9 }
 0x153   : > { %746 = shalt.err (!%p743_p1)
}
 0x154   : > { %577 = dma.vmem_to_hbm [thread:$0]  (%p1123_p4), %s1048_s11, 128, %s1046_s30, %s402_s21  }
 0x155 PF: > { %p588_p5 = scmp.ge.s32.totalorder %s841_s25, 2  ;;  %s429_s18 = sand.u32 1, %s801_s15  }
 0x156   : > { %p1124_p7 = scmp.ne.s32.totalorder %s1121_s14, 0  ;;  %s430_s5 = scalar_lea.sflag [#allocation4], %s429_s18 }
 0x158   : > { %p584_p3 = pnand %p588_p5, %p1124_p7 }
 0x15a   : > { %796 = dma.done.wait (!%p584_p3), %s430_s5, 128  }
 0x15b   : > { %798 = vsyncadd (!%p584_p3), %s430_s5, 4294967168  ;;  %s20_s25 = sadd.s32 1, %s841_s25   ;;  %s1125_s13 = sld [smem:[#allocation8_spill]] }
 0x15c   : > { %p17_p10 = scmp.ge.s32.totalorder %s20_s25, 8   ;;  %s1126_s11 = sld [smem:[#allocation9_spill]] }
 0x15d   : > { %s1127_s15 = smov %s805_s16  ;;  %s1128_s16 = smov %s809_s17 }
 0x15e   : > { %s1129_s17 = smov %s965_s12  ;;  %s1130_s18 = smov %s817_s19 }
 0x15f   : > { %s1131_s19 = smov %s821_s20  ;;  %s1132_s20 = smov %s951_s7 }
 0x160   : > { %s1133_s21 = smov %s833_s23  ;;  %s1134_s22 = smov %s837_s24 }
 0x161   : > { %s1135_s23 = smov %s1125_s13  ;;  %19 = sbr.rel (!%p17_p10) target bundleno = 9 (0x9), region = 90 }
 0x162   : > { %s1136_s24 = smov %s1126_s11 }
 0x168   :  { %435 = vsyncpa [#allocation3], 1 }
 0x169   :  { %437 = vsyncpa [#allocation3 + $0x1], 1 }
 0x16a   :  { %438 = vsyncpa [#allocation4], 1 }
 0x16b   :  { %440 = vsyncpa [#allocation4 + $0x1], 1 }

</bundles_post_ra>
